<compile_context>
chip_gen: v7x
topology: tpu7x:2x2x1
jax: 0.10.0
libtpu: 0.0.40
codegen_flags: <defaults>
</compile_context>

<pallas_src>
import functools

import jax
import jax.numpy as jnp
from jax.experimental import pallas as pl
from jax.experimental.pallas import tpu as pltpu


def _recall_kernel(x_ref, t_ref, out_ref, acc_ref, *, hw, tile):
    """Per-tile: channel softmax + per-class TP / sum(t) partial reductions.

    x_ref, t_ref : (1, C, tile) VMEM tiles (logits, targets) for batch n
    out_ref      : (1, 2, C) per-batch accumulated [TP; sum(t)] per class
    acc_ref      : (2, C) f32 scratch accumulator, resident across the lane axis
    """
    i = pl.program_id(1)  # lane-tile index (reduction axis, innermost)

    @pl.when(i == 0)
    def _():
        acc_ref[...] = jnp.zeros_like(acc_ref)

    x = x_ref[0].astype(jnp.float32)   # (C, tile)
    t = t_ref[0].astype(jnp.float32)   # (C, tile)

    # Mask out-of-range lanes of the last (partial) tile.  Static branch:
    # no code is emitted when HW divides the tile evenly.
    if hw % tile != 0:
        lane = jax.lax.broadcasted_iota(jnp.int32, x.shape, 1)
        valid = (i * tile + lane) < hw
        x = jnp.where(valid, x, 0.0)
        t = jnp.where(valid, t, 0.0)

    # Softmax over the channel axis (axis 0 of the (C, tile) block).
    m = jnp.max(x, axis=0, keepdims=True)
    e = jnp.exp(x - m)
    p = e * pl.reciprocal(jnp.sum(e, axis=0, keepdims=True), approx=False)

    acc_ref[0, :] = acc_ref[0, :] + jnp.sum(p * t, axis=1)   # TP_c
    acc_ref[1, :] = acc_ref[1, :] + jnp.sum(t, axis=1)       # sum(t)_c == TP+FN

    @pl.when(i == pl.num_programs(1) - 1)
    def _():
        out_ref[0] = acc_ref[...]


def weighted_recall_loss(inputs_nchw, target_nchw, class_weights, smooth=1e-6,
                         *, max_tile=2048,
                         input_vmem_budget_bytes=16 * 1024 * 1024):
    """inputs: (N, C, H, W) logits. target: (N, C, H, W) one-hot/soft targets
    (any float/int dtype; narrower dtypes reduce HBM traffic).
    Returns scalar loss (float32)."""
    N, C, H, W = inputs_nchw.shape
    HW = H * W

    # Free reshapes (no data movement): NCHW -> (N, C, H*W).
    x = inputs_nchw.reshape(N, C, HW)
    t = target_nchw.reshape(N, C, HW)

    # Pick the lane tile: as large as possible (multiple of 128), but keep the
    # double-buffered input footprint (2 inputs x 2 buffers x C x tile) under
    # a budget that leaves headroom on v7x's 64 MiB VMEM.
    bytes_per_lane = 2 * C * (x.dtype.itemsize + t.dtype.itemsize)
    tile = min(max_tile, input_vmem_budget_bytes // max(bytes_per_lane, 1))
    tile = max(128, (tile // 128) * 128)
    if tile >= HW:
        tile = HW                       # full-extent lane block (always legal)
    n_tiles = pl.cdiv(HW, tile)

    kernel = functools.partial(_recall_kernel, hw=HW, tile=tile)

    # Per-batch partial sums: (N, 2, C) with N on a "parallel" grid axis so the
    # second TensorCore (v7x megacore) gets its own accumulator.
    partial = pl.pallas_call(
        kernel,
        out_shape=jax.ShapeDtypeStruct((N, 2, C), jnp.float32),
        grid_spec=pltpu.PrefetchScalarGridSpec(
            num_scalar_prefetch=0,
            grid=(N, n_tiles),
            in_specs=[
                pl.BlockSpec((1, C, tile), lambda n, i: (n, 0, i)),
                pl.BlockSpec((1, C, tile), lambda n, i: (n, 0, i)),
            ],
            out_specs=pl.BlockSpec((1, 2, C), lambda n, i: (n, 0, 0)),
            scratch_shapes=[pltpu.VMEM((2, C), jnp.float32)],
        ),
        compiler_params=pltpu.CompilerParams(
            dimension_semantics=("parallel", "arbitrary"),
            vmem_limit_bytes=32 * 1024 * 1024,
        ),
    )(x, t)

    tp = jnp.sum(partial[:, 0, :], axis=0)      # (C,)
    tsum = jnp.sum(partial[:, 1, :], axis=0)    # (C,)  == TP + FN (exact algebra)

    recall_c = tp / (tsum + smooth)
    cw = class_weights.astype(jnp.float32)
    weighted_recall = jnp.sum(cw * recall_c) / jnp.sum(cw)
    return 1.0 - weighted_recall


def _reference_loss(inputs, target, class_weights, smooth=1e-6):
    """Pure-JAX reference mirroring the PyTorch forward exactly."""
    probs = jax.nn.softmax(inputs, axis=1)
    recall_sum = 0.0
    for c in range(probs.shape[1]):
        p_c = probs[:, c, :, :]
        t_c = target[:, c, :, :]
        TP = jnp.sum(p_c * t_c)
        FN = jnp.sum((1.0 - p_c) * t_c)
        recall_sum = recall_sum + class_weights[c] * (TP / (TP + FN + smooth))
    return 1.0 - recall_sum / jnp.sum(class_weights)


if __name__ == "__main__":
    key = jax.random.PRNGKey(0)
    k_x, k_t = jax.random.split(key)

    N, C, H, W = 2, 4, 16, 16

    # Deterministic "parameters" of the module: per-class weights.
    class_weights = jnp.array([1.0, 2.0, 0.5, 1.5], dtype=jnp.float32)

    # Logits (f32) and one-hot targets.  Targets are built in bfloat16 (exact
    # 0/1 values) to halve target HBM traffic; f32 targets also work.
    inputs = jax.random.normal(k_x, (N, C, H, W), dtype=jnp.float32)
    labels = jax.random.randint(k_t, (N, H, W), 0, C)
    target = jnp.transpose(
        jax.nn.one_hot(labels, C, dtype=jnp.bfloat16), (0, 3, 1, 2)
    )  # (N, C, H, W)

    loss = weighted_recall_loss(inputs, target, class_weights)
    loss = jax.block_until_ready(loss)

    ref = jax.block_until_ready(
        _reference_loss(inputs, target.astype(jnp.float32), class_weights)
    )
    assert jnp.allclose(loss, ref, atol=1e-5, rtol=1e-5), (loss, ref)

    print("KERNEL_OK")
</pallas_src>

<mosaic_0001>
module attributes {stable_mosaic.version = 11 : i64} {
  func.func @_recall_kernel(%arg0: i32, %arg1: i32, %arg2: memref<1x4x256xf32, #tpu.memory_space<vmem>>, %arg3: memref<1x4x256xbf16, #tpu.memory_space<vmem>>, %arg4: memref<1x2x4xf32, #tpu.memory_space<vmem>>, %arg5: memref<2x4xf32, #tpu.memory_space<vmem>>) attributes {dimension_semantics = [#tpu.dimension_semantics<parallel>, #tpu.dimension_semantics<arbitrary>], iteration_bounds = array<i64: 2, 1>, scalar_prefetch = 0 : i64, scratch_operands = 1 : i64, tpu.core_type = #tpu.core_type<tc>, window_params = [{transform_indices = @transform_0, window_bounds = array<i64: 1, 4, 256>}, {transform_indices = @transform_1, window_bounds = array<i64: 1, 4, 256>}, {transform_indices = @transform_2, window_bounds = array<i64: 1, 2, 4>}]} {
    %c0_i32 = arith.constant 0 : i32
    %0 = arith.cmpi eq, %arg1, %c0_i32 : i32
    %1 = arith.extui %0 : i1 to i32
    %c0_i32_0 = arith.constant 0 : i32
    %2 = arith.cmpi ne, %1, %c0_i32_0 : i32
    scf.if %2 {
      %cst_18 = arith.constant 0.000000e+00 : f32
      %36 = vector.broadcast %cst_18 : f32 to vector<2x4xf32>
      %c0_19 = arith.constant 0 : index
      %c0_20 = arith.constant 0 : index
      %37 = vector.load %arg5[%c0_19, %c0_20] : memref<2x4xf32, #tpu.memory_space<vmem>>, vector<2x4xf32>
      tpu.vector_store %arg5[%c0_19, %c0_20], %36 {strides = array<i32>} : memref<2x4xf32, #tpu.memory_space<vmem>>, vector<2x4xf32>,
    } else {
    }
    %c0 = arith.constant 0 : index
    %c0_1 = arith.constant 0 : index
    %c0_2 = arith.constant 0 : index
    %3 = vector.load %arg2[%c0, %c0_1, %c0_2] : memref<1x4x256xf32, #tpu.memory_space<vmem>>, vector<1x4x256xf32>
    %4 = vector.shape_cast %3 : vector<1x4x256xf32> to vector<4x256xf32>
    %c0_3 = arith.constant 0 : index
    %c0_4 = arith.constant 0 : index
    %c0_5 = arith.constant 0 : index
    %5 = vector.load %arg3[%c0_3, %c0_4, %c0_5] : memref<1x4x256xbf16, #tpu.memory_space<vmem>>, vector<1x4x256xbf16>
    %6 = vector.shape_cast %5 : vector<1x4x256xbf16> to vector<4x256xbf16>
    %7 = arith.extf %6 : vector<4x256xbf16> to vector<4x256xf32>
    %cst = arith.constant dense<0xFF800000> : vector<256xf32>
    %8 = vector.multi_reduction <maximumf>, %4, %cst [0] : vector<4x256xf32> to vector<256xf32>
    %9 = vector.shape_cast %8 : vector<256xf32> to vector<1x256xf32>
    %10 = vector.broadcast %9 : vector<1x256xf32> to vector<4x256xf32>
    %11 = arith.subf %4, %10 : vector<4x256xf32>
    %12 = math.exp %11 : vector<4x256xf32>
    %cst_6 = arith.constant dense<0.000000e+00> : vector<256xf32>
    %13 = vector.multi_reduction <add>, %12, %cst_6 [0] : vector<4x256xf32> to vector<256xf32>
    %14 = vector.shape_cast %13 : vector<256xf32> to vector<1x256xf32>
    %15 = tpu.reciprocal %14 : vector<1x256xf32> -> vector<1x256xf32>
    %16 = vector.broadcast %15 : vector<1x256xf32> to vector<4x256xf32>
    %17 = arith.mulf %12, %16 : vector<4x256xf32>
    %c0_7 = arith.constant 0 : index
    %c0_8 = arith.constant 0 : index
    %18 = vector.load %arg5[%c0_7, %c0_8] : memref<2x4xf32, #tpu.memory_space<vmem>>, vector<1x4xf32>
    %19 = vector.shape_cast %18 : vector<1x4xf32> to vector<4xf32>
    %20 = arith.mulf %17, %7 : vector<4x256xf32>
    %cst_9 = arith.constant dense<0.000000e+00> : vector<4xf32>
    %21 = vector.multi_reduction <add>, %20, %cst_9 [1] : vector<4x256xf32> to vector<4xf32>
    %22 = arith.addf %19, %21 : vector<4xf32>
    %c0_10 = arith.constant 0 : index
    %c0_11 = arith.constant 0 : index
    %23 = vector.load %arg5[%c0_10, %c0_11] : memref<2x4xf32, #tpu.memory_space<vmem>>, vector<1x4xf32>
    %24 = vector.shape_cast %23 : vector<1x4xf32> to vector<4xf32>
    %25 = vector.shape_cast %22 : vector<4xf32> to vector<1x4xf32>
    tpu.vector_store %arg5[%c0_10, %c0_11], %25 {strides = array<i32>} : memref<2x4xf32, #tpu.memory_space<vmem>>, vector<1x4xf32>,
    %c1 = arith.constant 1 : index
    %c0_12 = arith.constant 0 : index
    %26 = vector.load %arg5[%c1, %c0_12] : memref<2x4xf32, #tpu.memory_space<vmem>>, vector<1x4xf32>
    %27 = vector.shape_cast %26 : vector<1x4xf32> to vector<4xf32>
    %cst_13 = arith.constant dense<0.000000e+00> : vector<4xf32>
    %28 = vector.multi_reduction <add>, %7, %cst_13 [1] : vector<4x256xf32> to vector<4xf32>
    %29 = arith.addf %27, %28 : vector<4xf32>
    %c1_14 = arith.constant 1 : index
    %c0_15 = arith.constant 0 : index
    %30 = vector.load %arg5[%c1_14, %c0_15] : memref<2x4xf32, #tpu.memory_space<vmem>>, vector<1x4xf32>
    %31 = vector.shape_cast %30 : vector<1x4xf32> to vector<4xf32>
    %32 = vector.shape_cast %29 : vector<4xf32> to vector<1x4xf32>
    tpu.vector_store %arg5[%c1_14, %c0_15], %32 {strides = array<i32>} : memref<2x4xf32, #tpu.memory_space<vmem>>, vector<1x4xf32>,
    %c0_i32_16 = arith.constant 0 : i32
    %33 = arith.cmpi eq, %arg1, %c0_i32_16 : i32
    %34 = arith.extui %33 : i1 to i32
    %c0_i32_17 = arith.constant 0 : i32
    %35 = arith.cmpi ne, %34, %c0_i32_17 : i32
    scf.if %35 {
      %c0_18 = arith.constant 0 : index
      %c0_19 = arith.constant 0 : index
      %36 = vector.load %arg5[%c0_18, %c0_19] : memref<2x4xf32, #tpu.memory_space<vmem>>, vector<2x4xf32>
      %c0_20 = arith.constant 0 : index
      %c0_21 = arith.constant 0 : index
      %c0_22 = arith.constant 0 : index
      %37 = vector.load %arg4[%c0_20, %c0_21, %c0_22] : memref<1x2x4xf32, #tpu.memory_space<vmem>>, vector<1x2x4xf32>
      %38 = vector.shape_cast %37 : vector<1x2x4xf32> to vector<2x4xf32>
      %39 = vector.shape_cast %36 : vector<2x4xf32> to vector<1x2x4xf32>
      tpu.vector_store %arg4[%c0_20, %c0_21, %c0_22], %39 {strides = array<i32>} : memref<1x2x4xf32, #tpu.memory_space<vmem>>, vector<1x2x4xf32>,
    } else {
    }
    return
  }
  func.func @transform_0(%arg0: i32, %arg1: i32) -> (i32, i32, i32) {
    %c0_i32 = arith.constant 0 : i32
    %c0_i32_0 = arith.constant 0 : i32
    return %arg0, %c0_i32, %arg1 : i32, i32, i32
  }
  func.func @transform_1(%arg0: i32, %arg1: i32) -> (i32, i32, i32) {
    %c0_i32 = arith.constant 0 : i32
    %c0_i32_0 = arith.constant 0 : i32
    return %arg0, %c0_i32, %arg1 : i32, i32, i32
  }
  func.func @transform_2(%arg0: i32, %arg1: i32) -> (i32, i32, i32) {
    %c0_i32 = arith.constant 0 : i32
    %c0_i32_0 = arith.constant 0 : i32
    %c0_i32_1 = arith.constant 0 : i32
    return %arg0, %c0_i32, %c0_i32_0 : i32, i32, i32
  }
}

</mosaic_0001>

<bundles_post_ra>
// kernel: tpu_custom_call.1
= control target key start
LH: loop header
LB: loop body
LE: loop exit
PB: predicated region body
PF: predicated region fallthrough
CT: control target
= control target key end

     0   :  { %7 = vsyncpa [#allocation4], 0  ;;  %s934_s0 = inlined_call_operand.hbm [shape: f32[2,4,256], index: 0, kind: input, shape index: {}]   ;;  %s935_s1 = inlined_call_operand.hbm [shape: bf16[2,4,256], index: 1, kind: input, shape index: {}]   ;;  %s936_s2 = inlined_call_operand.hbm [shape: f32[2,2,4], index: 2, kind: output, shape index: {}]  }
   0x1   :  { %9 = vsyncpa [#allocation4 + $0x1], 0 }
   0x2   :  { %10 = vsyncpa [#allocation7], 0 }
   0x3   :  { %12 = vsyncpa [#allocation7 + $0x1], 0 }
   0x4   :  { %13 = vsyncpa [#allocation5], 0 }
   0x5   :  { %15 = vsyncpa [#allocation5 + $0x1], 0  ;;  %s705_s9 = smov 0   ;;  %s707_s10 = smov 0  }
   0x6   :  { %s709_s11 = smov 0   ;;  %s711_s12 = smov 0  }
   0x7   :  { %s713_s13 = smov 0   ;;  %s715_s14 = smov 0  }
   0x8 LB: > { %s443_s15 = sadd.s32 4294967295, %s684_s14   ;;  %s444_s16 = sadd.s32 4294967294, %s684_s14   ;;  %s684_s14 = sphi %s715_s14, %s21_s14   ;;  %s680_s13 = sphi %s713_s13, %s956_s13   ;;  %s676_s12 = sphi %s711_s12, %s955_s12   ;;  %s672_s11 = sphi %s709_s11, %s954_s11   ;;  %s668_s10 = sphi %s707_s10, %s953_s10   ;;  %s664_s9 = sphi %s705_s9, %s952_s9  }
   0x9   : > { %s33_s17 = sadd.s32 1, %s680_s13  ;;  %s42_s18 = sadd.s32 1, %s672_s11 }
   0xa   : > { %p35_p0 = scmp.ge.s32.totalorder %s33_s17, 2  ;;  %p49_p1 = scmp.ne.s32.totalorder %s672_s11, %s668_s10 }
   0xb   : > { %p50_p2 = scmp.eq.s32.totalorder %s684_s14, 0  ;;  %p55_p3 = scmp.ne.s32.totalorder %s668_s10, %s664_s9 }
   0xc   : > { %s958_s17 = smov (%p35_p0, %s33_s17), 0  ;;  %p56_p5 = scmp.eq.s32.totalorder %s443_s15, 0 }
   0xd   : > { %p746_p4 = por %p50_p2, %p49_p1  ;;  %s37_s20 = ssub.s32 %s680_s13, %s958_s17 }
   0xe   : > { %p107_p6 = scmp.eq.s32.totalorder %s443_s15, 1  ;;  %p40_p7 = scmp.eq.s32.totalorder %s37_s20, 0 }
   0xf   : > { %p752_p8 = por %p56_p5, %p55_p3  ;;  %p113_p10 = scmp.eq.s32.totalorder %s444_s16, 1 }
  0x10   : > { %p756_p9 = por %p107_p6, %p49_p1  ;;  %p480_p13 = scmp.lt.s32.totalorder %s684_s14, 2 }
  0x11   : > { %s940_s21 = scalar_select %p752_p8, 1, 0 }
  0x12   : > { %s941_s22 = scalar_select %p756_p9, 1, 0 }
  0x13   : > { %s761_s23 = scalar_select %p40_p7, %s672_s11, %s42_s18  }
  0x14   : > { %p763_p11 = por %p113_p10, %p55_p3  ;;  %s770_s25 = sand.u32 1, %s672_s11  }
  0x15   : > { %s447_s26 = sshll.u32 %s770_s25, 3  ;;  %s461_s27 = sshll.u32 %s680_s13, 7 }
  0x16   : > { %s942_s24 = scalar_select %p763_p11, 1, 0 }
  0x17   : > { %s777_s30 = scalar_lea.hbm %s934_s0, %s461_s27  ;;  %s137_s3 = scalar_lea.vmem [#allocation3], %s447_s26 }
  0x18   : > { %s147_s4 = sshll.u32 %s137_s3, 4  ;;  %p783_p0 = pnand %p480_p13, %p746_p4  ;;  %s779_s4 = int_to_ptr.vmem [resolvable:$true] %s147_s4 }
  0x19   : > { %s134_s6 = scalar_lea.sflag [#allocation4], %s770_s25  ;;  %s538_s7 = scalar_lea.hbm %s777_s30, 128 }
  0x1a   : > { %p539_p3 = scmp.ne.s32.totalorder %s777_s30, %s538_s7  ;;  %p540_p5 = pneg %p783_p0 }
  0x1b   : > { %s543_s16 = scalar_lea.hbm %s934_s0, 256  ;;  %p544_p4 = scmp.lt.u32.totalorder %s777_s30, %s934_s0 }
  0x1c   : > { %p541_p6 = pnand %p540_p5, %p539_p3  ;;  %p545_p10 = scmp.lt.u32.totalorder %s543_s16, %s538_s7 }
  0x1d   : > { %p547_p12 = scmp.lt.u32.totalorder %s538_s7, %s777_s30 }
  0x1e   : > { %p542_p7 = pneg %p541_p6  ;;  %p546_p13 = por %p545_p10, %p544_p4 }
  0x20   : > { %p548_p1 = por %p547_p12, %p546_p13 }
  0x22   : > { %p549_p2 = pnand %p548_p1, %p542_p7 }
  0x24   : > { %552 = shalt.err (!%p549_p2)
}
  0x25   : > { %s553_s20 = scalar_lea.vmem %s779_s4, 128  ;;  %s686_s26 = smov [#allocation3]  }
  0x26   : > { %p554_p3 = scmp.ne.s32.totalorder %s779_s4, %s553_s20  ;;  %s558_s27 = sshll.u32 %s686_s26, 4  ;;  %s559_s27 = int_to_ptr.vmem [resolvable:$false] %s558_s27 }
  0x27   : > { %s560_s28 = scalar_lea.vmem %s559_s27, 256  ;;  %p561_p9 = scmp.lt.s32.totalorder %s779_s4, %s559_s27 }
  0x28   : > { %p556_p6 = pnand %p554_p3, %p540_p5  ;;  %p562_p4 = scmp.lt.s32.totalorder %s560_s28, %s553_s20 }
  0x2a   : > { %p557_p11 = pneg %p556_p6  ;;  %p563_p10 = por %p562_p4, %p561_p9 }
  0x2c   : > { %p564_p12 = pnand %p563_p10, %p557_p11 }
  0x2e   : > { %567 = shalt.err (!%p564_p12)
}
  0x2f   : > { %472 = dma.hbm_to_vmem [thread:$0]  (!%p783_p0), %s777_s30, 128, %s779_s4, %s134_s6  }
  0x30   : > { %p944_p1 = scmp.lt.s32.totalorder %s684_s14, 3  ;;  %p945_p2 = scmp.ge.s32.totalorder %s684_s14, 1 }
  0x31   : > { %s450_s3 = sshll.u32 %s770_s25, 2  ;;  %s462_s7 = sshll.u32 %s680_s13, 6 }
  0x32   : > { %p819_p7 = pnand %p945_p2, %p944_p1  ;;  %s828_s16 = scalar_lea.hbm %s935_s1, %s462_s7 }
  0x33   : > { %s158_s18 = scalar_lea.vmem [#allocation6], %s450_s3  ;;  %s155_s30 = scalar_lea.sflag [#allocation7], %s770_s25 }
  0x34   : > { %s946_s29 = scalar_select %p819_p7, 1, 0 }
  0x35   : > { %s168_s19 = sshll.u32 %s158_s18, 4  ;;  %s568_s4 = scalar_lea.hbm %s828_s16, 64  ;;  %s169_s19 = int_to_ptr.vmem [resolvable:$true] %s168_s19 }
  0x36   : > { %p569_p9 = scmp.ne.s32.totalorder %s828_s16, %s568_s4  ;;  %s573_s26 = scalar_lea.hbm %s935_s1, 128 }
  0x37   : > { %p574_p3 = scmp.lt.u32.totalorder %s828_s16, %s935_s1  ;;  %p575_p6 = scmp.lt.u32.totalorder %s573_s26, %s568_s4 }
  0x38   : > { %p571_p11 = pnand %p569_p9, %p540_p5  ;;  %p577_p10 = scmp.lt.u32.totalorder %s568_s4, %s828_s16 }
  0x39   : > { %p576_p4 = por %p575_p6, %p574_p3 }
  0x3a   : > { %p572_p13 = pneg %p571_p11 }
  0x3b   : > { %p578_p12 = por %p577_p10, %p576_p4 }
  0x3d   : > { %p579_p1 = pnand %p578_p12, %p572_p13 }
  0x3f   : > { %582 = shalt.err (!%p579_p1)
}
  0x40   : > { %s583_s25 = scalar_lea.vmem %s169_s19, 64  ;;  %s687_s3 = smov [#allocation6]  }
  0x41   : > { %p584_p2 = scmp.ne.s32.totalorder %s169_s19, %s583_s25  ;;  %s588_s7 = sshll.u32 %s687_s3, 4  ;;  %s589_s7 = int_to_ptr.vmem [resolvable:$false] %s588_s7 }
  0x42   : > { %s590_s8 = scalar_lea.vmem %s589_s7, 128  ;;  %p591_p8 = scmp.lt.s32.totalorder %s169_s19, %s589_s7 }
  0x43   : > { %p586_p9 = pnand %p584_p2, %p540_p5  ;;  %p592_p7 = scmp.lt.s32.totalorder %s590_s8, %s583_s25 }
  0x45   : > { %p587_p11 = pneg %p586_p9  ;;  %p593_p3 = por %p592_p7, %p591_p8 }
  0x47   : > { %p594_p6 = pnand %p593_p3, %p587_p11 }
  0x49   : > { %597 = shalt.err (!%p594_p6)
}
  0x4a   : > { %475 = dma.hbm_to_vmem [thread:$0]  (!%p783_p0), %s828_s16, 64, %s169_s19, %s155_s30  }
  0x4b   : > { %p947_p13 = scmp.ne.s32.totalorder %s946_s29, 0 }
  0x4c   : > { %s853_s15 = sand.u32 (!%p947_p13), 1, %s668_s10   ;;  %p948_p5 = scmp.ne.s32.totalorder (!%p947_p13), %s940_s21, 0 }
  0x4d   : > { %177 = sbr.rel (%p947_p13) target bundleno = 330 (0x14a), region = 28  ;;  %s454_s18 = sshll.u32 (!%p947_p13), %s853_s15, 3 }
  0x4e   : > { %s180_s4 = scalar_lea.sflag (!%p947_p13), [#allocation4], %s853_s15  ;;  %s183_s6 = scalar_lea.vmem (!%p947_p13), [#allocation3], %s454_s18 }
  0x54   : > { %651 = dma.done.wait (%p948_p5), %s180_s4, 128  }
  0x55   : > { %653 = vsyncadd (%p948_p5), %s180_s4, 4294967168  ;;  %s455_s5 = sshll.u32 %s853_s15, 2  ;;  %s189_s29 = scalar_lea.sflag [#allocation7], %s853_s15 }
  0x56   : > { %s863_s16 = scalar_lea.vmem [#allocation6], %s455_s5 }
  0x57   : > { %655 = dma.done.wait (%p948_p5), %s189_s29, 64  }
  0x58   : > { %657 = vsyncadd (%p948_p5), %s189_s29, 4294967232  ;;  %vm224_vm0 = vcmask 25600   ;;  %v688_v0 = vmov 0.0   ;;  %vm232_vm1 = vcmask 1043456   ;;  %v226_v1 = vld [vmem:[%s183_s6] sm:$0xff]  ;;  %v289_v51 = vlaneseq  ;;  %s456_s21 = sshll.u32 %s853_s15, 1 }
  0x59   : > { %225 = vst.msk [vmem:[#allocation2] sm:$0x3] %vm224_vm0, %v688_v0  ;;  %v230_v2 = vcombine.high %v226_v1, %v226_v1  ;;  %v233_v3 = vsel %vm232_vm1, %v226_v1, -inf  ;;  %v227_v37 = vld [vmem:[%s863_s16] sm:$0xf]  ;;  %vm297_vm2 = vcmask 24576  }
  0x5a   : > { %v234_v4 = vrot.slane %v233_v3, 4  ;;  %v228_v39 = vunpack.c.l.bf16 %v227_v37  ;;  %v290_v52 = vand.u32 127, %v289_v51  ;;  %v292_v53 = vshrl.u32 %v289_v51, 7  ;;  %s458_s19 = sshll.u32 %s676_s12, 5  ;;  %s217_s30 = scalar_lea.vmem [#allocation8], %s456_s21 }
  0x5b   : > { %v240_v5 = vsel %vm232_vm1, %v230_v2, -inf  ;;  %s336_s20 = sshll.u32 %s217_s30, 4  ;;  %s884_s28 = scalar_lea.hbm %s936_s2, %s458_s19  ;;  %s886_s20 = int_to_ptr.vmem [resolvable:$true] %s336_s20 }
  0x5c   : > { %v235_v6 = vmax.f32 %v233_v3, %v234_v4  ;;  %v241_v7 = vrot.slane %v240_v5, 4  ;;  %v301_v43 = vcombine.high %v228_v39, %v228_v39  ;;  %v303_v47 = vsel %vm232_vm1, %v228_v39, 0.0  ;;  %s323_s25 = scalar_lea.sflag [#allocation5], %s853_s15  ;;  %s598_s3 = scalar_lea.vmem %s886_s20, 32 }
  0x5d   : > { %v293_v54 = vsub.s32 %v290_v52, %v292_v53  ;;  %p599_p8 = scmp.ne.s32.totalorder %s886_s20, %s598_s3  ;;  %p949_p0 = scmp.ne.s32.totalorder %s941_s22, 0 }
  0x5e   : > { %v236_v8 = vrot.slane %v235_v6, 2  ;;  %v242_v9 = vmax.f32 %v240_v5, %v241_v7  ;;  %v304_v48 = vsel %vm232_vm1, %v301_v43, 0.0  ;;  %s689_s12 = smov [#allocation8]  }
  0x5f   : > { %v305_v50 = vadd.f32 %v304_v48, %v303_v47  ;;  %p600_p7 = pnand %p599_p8, %p949_p0  ;;  %s602_s7 = sshll.u32 %s689_s12, 4  ;;  %s603_s7 = int_to_ptr.vmem [resolvable:$false] %s602_s7 }
  0x60   : > { %v237_v10 = vmax.f32 %v235_v6, %v236_v8  ;;  %v243_v11 = vrot.slane %v242_v9, 2  ;;  %v278_v56 = vld [vmem:[#allocation2] sm:$0x1]  ;;  %v299_v60 = vld [vmem:[#allocation2 + $0x1] sm:$0x1]  ;;  %s604_s8 = scalar_lea.vmem %s603_s7, 64  ;;  %p605_p10 = scmp.lt.s32.totalorder %s886_s20, %s603_s7 }
  0x61   : > { %p601_p4 = pneg %p600_p7  ;;  %p606_p12 = scmp.lt.s32.totalorder %s604_s8, %s598_s3 }
  0x62   : > { %v238_v12 = vrot.slane %v237_v10, 1  ;;  %v244_v13 = vmax.f32 %v242_v9, %v243_v11 }
  0x63   : > { %p607_p1 = por %p606_p12, %p605_p10 }
  0x64   : > { %v239_v14 = vmax.f32 %v237_v10, %v238_v12  ;;  %v245_v15 = vrot.slane %v244_v13, 1 }
  0x65   : > { %p608_p2 = pnand %p607_p1, %p601_p4 }
  0x66   : > { %v246_v16 = vmax.f32 %v244_v13, %v245_v15 }
  0x68   : > { %v249_v17 = vcombine.low %v239_v14, %v246_v16 }
  0x6a   : > { %v251_v18 = vsub.f32 %v226_v1, %v249_v17 }
  0x6c   : > { %v252_v19 = vmul.f32 1.442695, %v251_v18 }
  0x6e   : > { %532 = vpow2.f32 %v252_v19 }
  0x78   : > { %v533_v20 = vpop.eup %532 }
  0x79   : > { %v255_v21 = vcombine.high %v533_v20, %v533_v20  ;;  %v257_v22 = vsel %vm232_vm1, %v533_v20, 0.0 }
  0x7a   : > { %v258_v23 = vrot.slane %v257_v22, 4 }
  0x7b   : > { %v264_v24 = vsel %vm232_vm1, %v255_v21, 0.0 }
  0x7c   : > { %v259_v25 = vadd.f32 %v258_v23, %v257_v22  ;;  %v265_v26 = vrot.slane %v264_v24, 4 }
  0x7e   : > { %v260_v27 = vrot.slane %v259_v25, 2  ;;  %v266_v28 = vadd.f32 %v265_v26, %v264_v24 }
  0x80   : > { %v261_v29 = vadd.f32 %v260_v27, %v259_v25  ;;  %v267_v30 = vrot.slane %v266_v28, 2 }
  0x82   : > { %v262_v31 = vrot.slane %v261_v29, 1  ;;  %v268_v32 = vadd.f32 %v267_v30, %v266_v28 }
  0x84   : > { %v263_v33 = vadd.f32 %v262_v31, %v261_v29  ;;  %v269_v34 = vrot.slane %v268_v32, 1 }
  0x86   : > { %v270_v35 = vadd.f32 %v269_v34, %v268_v32  ;;  %534 = vrcp.f32 %v263_v33 }
  0x88   : > { %536 = vrcp.f32 %v270_v35 }
  0x90   : > { %v535_v36 = vpop.eup %534 }
  0x92   : > { %v537_v38 = vpop.eup %536 }
  0x93   : > { %v275_v40 = vcombine.low %v535_v36, %v537_v38 }
  0x95   : > { %v277_v41 = vmul.f32 %v533_v20, %v275_v40 }
  0x97   : > { %v279_v42 = vmul.f32 %v277_v41, %v228_v39 }
  0x99   : > { %v281_v44 = vcombine.high %v279_v42, %v279_v42  ;;  %v283_v45 = vsel %vm232_vm1, %v279_v42, 0.0 }
  0x9b   : > { %v284_v46 = vsel %vm232_vm1, %v281_v44, 0.0 }
  0x9c   : > { %v285_v49 = vadd.f32 %v284_v46, %v283_v45 }
  0x9e   : > { %286 = vadd.xlane.f32.xlu0 %v285_v49 }
  0xa2   : > { %306 = vadd.xlane.f32.xlu0 %v305_v50 }
 0x12b   : > { %v287_v55 = vpop.xlane.xlu0 %286 }
 0x12c   : > { %v294_v57 = vrot.slane %v287_v55, %v293_v54 }
 0x12e   : > { %v296_v58 = vadd.f32 %v294_v57, %v278_v56 }
 0x12f   : > { %v307_v59 = vpop.xlane.xlu0 %306 }
 0x130   : > { %298 = vst.msk [vmem:[#allocation2] sm:$0x1] %vm297_vm2, %v296_v58  ;;  %v312_v61 = vrot.slane %v307_v59, %v293_v54 }
 0x132   : > { %v314_v62 = vadd.f32 %v312_v61, %v299_v60 }
 0x134   : > { %315 = vst.msk [vmem:[#allocation2 + $0x1] sm:$0x1] %vm297_vm2, %v314_v62 }
 0x13b   : > { %v319_v63 = vld [vmem:[#allocation2] sm:$0x3] }
 0x13c   : > { %321 = vst.msk [vmem:[%s217_s30] sm:$0x3] %vm224_vm0, %v319_v63 }
 0x13d   : > { %611 = shalt.err (!%p608_p2)
}
 0x13e   : > { %s612_s15 = scalar_lea.hbm %s884_s28, 32  ;;  %s616_s6 = scalar_lea.hbm %s936_s2, 64 }
 0x13f   : > { %p613_p9 = scmp.ne.s32.totalorder %s884_s28, %s612_s15  ;;  %p617_p6 = scmp.lt.u32.totalorder %s884_s28, %s936_s2 }
 0x140   : > { %p618_p13 = scmp.lt.u32.totalorder %s616_s6, %s612_s15  ;;  %p620_p8 = scmp.lt.u32.totalorder %s612_s15, %s884_s28 }
 0x141   : > { %p614_p11 = pnand %p613_p9, %p949_p0 }
 0x142   : > { %p619_p5 = por %p618_p13, %p617_p6 }
 0x143   : > { %p615_p3 = pneg %p614_p11 }
 0x144   : > { %p621_p7 = por %p620_p8, %p619_p5 }
 0x146   : > { %p622_p4 = pnand %p621_p7, %p615_p3 }
 0x148   : > { %625 = shalt.err (!%p622_p4)
}
 0x149   : > { %467 = dma.vmem_to_hbm [thread:$0]  (%p949_p0), %s886_s20, 32, %s884_s28, %s323_s25  }
 0x14a PF: > { %s348_s16 = sand.u32 1, %s664_s9   ;;  %p950_p10 = scmp.ne.s32.totalorder %s942_s24, 0 }
 0x14b   : > { %p951_p12 = scmp.ge.s32.totalorder %s684_s14, 2  ;;  %s349_s21 = scalar_lea.sflag [#allocation5], %s348_s16 }
 0x14d   : > { %p477_p1 = pnand %p951_p12, %p950_p10 }
 0x14f   : > { %659 = dma.done.wait (!%p477_p1), %s349_s21, 32  }
 0x150   : > { %661 = vsyncadd (!%p477_p1), %s349_s21, 4294967264  ;;  %s21_s14 = sadd.s32 1, %s684_s14   ;;  %s952_s9 = smov %s668_s10 }
 0x151   : > { %p18_p2 = scmp.ge.s32.totalorder %s21_s14, 4   ;;  %s953_s10 = smov %s672_s11 }
 0x152   : > { %s954_s11 = smov %s761_s23  ;;  %s955_s12 = smov %s680_s13 }
 0x153   : > { %s956_s13 = smov %s958_s17  ;;  %20 = sbr.rel (!%p18_p2) target bundleno = 8 (0x8), region = 94 }
 0x15a   :  { %354 = vsyncpa [#allocation4], 1 }
 0x15b   :  { %356 = vsyncpa [#allocation4 + $0x1], 1 }
 0x15c   :  { %357 = vsyncpa [#allocation7], 1 }
 0x15d   :  { %359 = vsyncpa [#allocation7 + $0x1], 1 }
 0x15e   :  { %360 = vsyncpa [#allocation5], 1 }
 0x15f   :  { %362 = vsyncpa [#allocation5 + $0x1], 1 }

</bundles_post_ra>
